<compile_context>
chip_gen: v6e
topology: v6e:2x2x1
jax: 0.10.0
libtpu: 0.0.40
codegen_flags: <defaults>
</compile_context>

<pallas_src>
import functools

import jax
import jax.numpy as jnp
import numpy as np
from jax.experimental import pallas as pl
from jax.experimental.pallas import tpu as pltpu


N_LAYERS = 10
F_PAD = 128           # lane-padded feature width used inside the kernel


# ----------------------------- Pallas kernel ------------------------------ #

def fused_gcn_kernel(a_ref, x_ref, w_ref, b_ref, o_ref, p0_ref, p1_ref, *,
                     num_layers, tr):
    """One grid step = one (pass, node-row-tile).

    a_ref : [TR, Np]            bf16  row tile of the normalized adjacency
    x_ref : [TR, F_PAD]         bf16  row tile of the padded input features
    w_ref : [L, F_PAD, F_PAD]   bf16  stacked, zero-padded layer weights (resident)
    b_ref : [L, 1, F_PAD]       f32   stacked, zero-padded biases        (resident)
    o_ref : [TR, F_PAD]         f32   row tile of the padded logits
    p0/p1 : [Np, F_PAD]         bf16  ping-pong scratch holding P_l = H_l @ W_l

    Pass 0      : P_0[rows]  = X[rows] @ W_0                        (transform only)
    Pass 1..L-1 : H_l[rows]  = relu(A[rows] @ P_{l-1} + b_{l-1})    (aggregate)
                  P_l[rows]  = H_l[rows] @ W_l                      (fused next transform)
    Pass L      : out[rows]  = A[rows] @ P_{L-1} + b_{L-1}          (last layer, no ReLU)
    """
    l = pl.program_id(0)
    r = pl.program_id(1)
    row0 = pl.multiple_of(r * tr, tr)
    rows = pl.ds(row0, tr)

    # ---- pass 0: input feature transform ----------------------------------
    @pl.when(l == 0)
    def _():
        p0 = jnp.dot(x_ref[...], w_ref[0], preferred_element_type=jnp.float32)
        p0_ref[rows, :] = p0.astype(jnp.bfloat16)

    # ---- passes 1..L-1: aggregate layer l-1, pre-transform for layer l ----
    def mid_layer(p_prev_ref, p_next_ref):
        agg = jnp.dot(a_ref[...], p_prev_ref[...],
                      preferred_element_type=jnp.float32)
        # PyG adds bias AFTER aggregation; ReLU on all but the last layer.
        h = jnp.maximum(agg + b_ref[l - 1], 0.0)
        # dropout(p=0.5, training=False) -> identity at inference.
        p_next = jnp.dot(h.astype(jnp.bfloat16), w_ref[l],
                         preferred_element_type=jnp.float32)
        p_next_ref[rows, :] = p_next.astype(jnp.bfloat16)

    mid = jnp.logical_and(l >= 1, l <= num_layers - 1)

    @pl.when(jnp.logical_and(mid, (l % 2) == 1))
    def _():
        mid_layer(p0_ref, p1_ref)          # read P_{l-1} (slot 0), write P_l (slot 1)

    @pl.when(jnp.logical_and(mid, (l % 2) == 0))
    def _():
        mid_layer(p1_ref, p0_ref)          # read P_{l-1} (slot 1), write P_l (slot 0)

    # Keep intermediate output write-backs deterministic (real values come last).
    @pl.when(l < num_layers)
    def _():
        o_ref[...] = jnp.zeros_like(o_ref)

    # ---- pass L: final layer (no ReLU), lane-dense f32 store ---------------
    p_last_ref = p1_ref if (num_layers - 1) % 2 == 1 else p0_ref

    @pl.when(l == num_layers)
    def _():
        agg = jnp.dot(a_ref[...], p_last_ref[...],
                      preferred_element_type=jnp.float32)
        o_ref[...] = agg + b_ref[num_layers - 1]


def gcn_forward(a_pad, x_pad, w_stack, b_stack, *, n_nodes, num_classes):
    n_pad = x_pad.shape[0]
    num_layers = w_stack.shape[0]
    # 256-row tiles fill the 2x256x256 MXU of v6e/v7x; 128 matches v5e / toy size.
    tr = 256 if n_pad % 256 == 0 else 128
    n_row_tiles = n_pad // tr

    flops = 2 * num_layers * (n_pad * F_PAD * F_PAD + n_pad * n_pad * F_PAD)
    bytes_accessed = (
        (num_layers + 1) * n_pad * n_pad * 2      # A row tiles, re-read per pass
        + n_pad * F_PAD * 2                       # X (bf16)
        + num_layers * F_PAD * F_PAD * 2          # W stack (bf16)
        + num_layers * F_PAD * 4                  # biases (f32)
        + n_pad * F_PAD * 4)                      # logits (f32)

    kernel = functools.partial(fused_gcn_kernel, num_layers=num_layers, tr=tr)
    out_pad = pl.pallas_call(
        kernel,
        out_shape=jax.ShapeDtypeStruct((n_pad, F_PAD), jnp.float32),
        grid=(num_layers + 1, n_row_tiles),
        in_specs=[
            pl.BlockSpec((tr, n_pad), lambda l, r: (r, 0)),                     # A_hat row tile
            pl.BlockSpec((tr, F_PAD), lambda l, r: (r, 0)),                     # X row tile
            pl.BlockSpec((num_layers, F_PAD, F_PAD), lambda l, r: (0, 0, 0)),   # W (resident)
            pl.BlockSpec((num_layers, 1, F_PAD), lambda l, r: (0, 0, 0)),       # b (resident)
        ],
        out_specs=pl.BlockSpec((tr, F_PAD), lambda l, r: (r, 0)),
        scratch_shapes=[
            pltpu.VMEM((n_pad, F_PAD), jnp.bfloat16),   # P ping
            pltpu.VMEM((n_pad, F_PAD), jnp.bfloat16),   # P pong
        ],
        compiler_params=pltpu.CompilerParams(
            # Row tiles within a pass are independent, but the P scratch carried
            # across the layer axis forces sequential execution -> arbitrary.
            dimension_semantics=("arbitrary", "arbitrary"),
            vmem_limit_bytes=64 * 1024 * 1024,
        ),
        cost_estimate=pl.CostEstimate(flops=flops, transcendentals=0,
                                      bytes_accessed=bytes_accessed),
    )(a_pad, x_pad, w_stack, b_stack)
    return out_pad[:n_nodes, :num_classes]


# --------------------------- glue (plain JAX) ------------------------------ #

def build_norm_adj(edge_index, num_nodes):
    """Dense D^-1/2 (A + I) D^-1/2, matching PyG gcn_norm (add_self_loops=True)."""
    src, dst = edge_index[0], edge_index[1]
    # Deduplicate random synthetic edges so adjacency entries stay binary.
    a = jnp.zeros((num_nodes, num_nodes), jnp.float32).at[dst, src].max(1.0)
    a = jnp.maximum(a, jnp.eye(num_nodes, dtype=jnp.float32))   # self loops
    deg = a.sum(axis=1)
    d_inv_sqrt = jnp.where(deg > 0, jax.lax.rsqrt(deg), 0.0)
    return d_inv_sqrt[:, None] * a * d_inv_sqrt[None, :]


def glorot(key, fan_in, fan_out):
    limit = jnp.sqrt(6.0 / (fan_in + fan_out))
    return jax.random.uniform(key, (fan_in, fan_out), jnp.float32, -limit, limit)


def init_params(key, num_features, hidden_channels, num_classes, num_layers):
    fan_ins = [num_features] + [hidden_channels] * (num_layers - 1)
    fan_outs = [hidden_channels] * (num_layers - 1) + [num_classes]
    params = []
    for fi, fo in zip(fan_ins, fan_outs):
        key, wk = jax.random.split(key)
        params.append((glorot(wk, fi, fo), jnp.zeros((fo,), jnp.float32)))
    return params


def stack_params(params):
    """Zero-pad every layer's W/b to (F_PAD, F_PAD)/(1, F_PAD) and stack."""
    n_layers = len(params)
    w_stack = jnp.zeros((n_layers, F_PAD, F_PAD), jnp.bfloat16)
    b_stack = jnp.zeros((n_layers, 1, F_PAD), jnp.float32)
    for l, (w, b) in enumerate(params):
        fi, fo = w.shape
        w_stack = w_stack.at[l, :fi, :fo].set(w.astype(jnp.bfloat16))
        b_stack = b_stack.at[l, 0, :fo].set(b)
    return w_stack, b_stack


def pad_graph(a_hat, x, n_pad):
    n, f_in = x.shape
    a_pad = jnp.zeros((n_pad, n_pad), jnp.float32).at[:n, :n].set(a_hat)
    x_pad = jnp.zeros((n_pad, F_PAD), jnp.float32).at[:n, :f_in].set(x)
    return a_pad.astype(jnp.bfloat16), x_pad.astype(jnp.bfloat16)


def gcn_reference(a_hat, x, params):
    """Plain-JAX reference mirroring the kernel's bf16-operand / f32-acc math.

    NOTE: this deliberately matches the kernel's bf16 activation carry; a pure
    f32 PyG GCN would drift slightly from both over 10 layers.
    """
    a = a_hat.astype(jnp.bfloat16)
    num_layers = len(params)
    p = jnp.dot(x.astype(jnp.bfloat16), params[0][0].astype(jnp.bfloat16),
                preferred_element_type=jnp.float32).astype(jnp.bfloat16)
    for l in range(1, num_layers):
        b_prev = params[l - 1][1]
        h = jnp.maximum(jnp.dot(a, p, preferred_element_type=jnp.float32) + b_prev, 0.0)
        p = jnp.dot(h.astype(jnp.bfloat16), params[l][0].astype(jnp.bfloat16),
                    preferred_element_type=jnp.float32).astype(jnp.bfloat16)
    return jnp.dot(a, p, preferred_element_type=jnp.float32) + params[-1][1]


# --------------------------------- main ------------------------------------ #

if __name__ == "__main__":
    key = jax.random.PRNGKey(0)

    # small synthetic Cora-like graph
    N = 128            # nodes
    F_IN = 32          # "num_features"
    HIDDEN = 32        # hidden_channels
    N_CLASSES = 8      # "num_classes"
    E = 512            # directed edges

    key, kx, ke, kp = jax.random.split(key, 4)
    x = jax.random.normal(kx, (N, F_IN), jnp.float32)
    # NormalizeFeatures(): row-normalize features (abs-sum to avoid /0)
    x = x / jnp.maximum(jnp.abs(x).sum(axis=1, keepdims=True), 1e-12)

    edge_index = jax.random.randint(ke, (2, E), 0, N, dtype=jnp.int32)
    a_hat = build_norm_adj(edge_index, N)

    params = init_params(kp, F_IN, HIDDEN, N_CLASSES, num_layers=N_LAYERS)
    w_stack, b_stack = stack_params(params)

    n_pad = ((N + F_PAD - 1) // F_PAD) * F_PAD   # pad nodes to a lane multiple
    a_pad_bf16, x_pad_bf16 = pad_graph(a_hat, x, n_pad)

    fwd = jax.jit(functools.partial(gcn_forward, n_nodes=N, num_classes=N_CLASSES))
    out = fwd(a_pad_bf16, x_pad_bf16, w_stack, b_stack)
    out = jax.block_until_ready(out)

    assert out.shape == (N, N_CLASSES), out.shape
    assert jnp.all(jnp.isfinite(out))

    # correctness check vs. plain-JAX reference (same bf16/f32 math)
    ref = jax.jit(lambda a, xx: gcn_reference(a, xx, params))(a_hat, x)
    ref = jax.block_until_ready(ref)
    np.testing.assert_allclose(np.asarray(out), np.asarray(ref),
                               rtol=1e-2, atol=1e-2)

    print("KERNEL_OK")
</pallas_src>

<mosaic_0001>
module attributes {stable_mosaic.version = 11 : i64} {
  func.func @fused_gcn_kernel(%arg0: i32, %arg1: i32, %arg2: memref<128x128xbf16, #tpu.memory_space<vmem>>, %arg3: memref<128x128xbf16, #tpu.memory_space<vmem>>, %arg4: memref<10x128x128xbf16, #tpu.memory_space<vmem>>, %arg5: memref<10x1x128xf32, #tpu.memory_space<vmem>>, %arg6: memref<128x128xf32, #tpu.memory_space<vmem>>, %arg7: memref<128x128xbf16, #tpu.memory_space<vmem>>, %arg8: memref<128x128xbf16, #tpu.memory_space<vmem>>) attributes {dimension_semantics = [#tpu.dimension_semantics<arbitrary>, #tpu.dimension_semantics<arbitrary>], iteration_bounds = array<i64: 11, 1>, scalar_prefetch = 0 : i64, scratch_operands = 2 : i64, tpu.core_type = #tpu.core_type<tc>, window_params = [{transform_indices = @transform_0, window_bounds = array<i64: 128, 128>}, {transform_indices = @transform_1, window_bounds = array<i64: 128, 128>}, {pipeline_mode = #tpu.pipeline_mode<synchronous>, transform_indices = @transform_2, window_bounds = array<i64: 10, 128, 128>}, {pipeline_mode = #tpu.pipeline_mode<synchronous>, transform_indices = @transform_3, window_bounds = array<i64: 10, 1, 128>}, {transform_indices = @transform_4, window_bounds = array<i64: 128, 128>}]} {
    %c128_i32 = arith.constant 128 : i32
    %0 = arith.muli %arg1, %c128_i32 : i32
    %1 = tpu.assume_multiple %0, 128 : i32
    %c0_i32 = arith.constant 0 : i32
    %2 = arith.cmpi eq, %arg0, %c0_i32 : i32
    %3 = arith.extui %2 : i1 to i32
    %c0_i32_0 = arith.constant 0 : i32
    %4 = arith.cmpi ne, %3, %c0_i32_0 : i32
    scf.if %4 {
      %c0 = arith.constant 0 : index
      %c0_19 = arith.constant 0 : index
      %42 = vector.load %arg3[%c0, %c0_19] : memref<128x128xbf16, #tpu.memory_space<vmem>>, vector<128x128xbf16>
      %c0_20 = arith.constant 0 : index
      %c0_21 = arith.constant 0 : index
      %c0_22 = arith.constant 0 : index
      %43 = vector.load %arg4[%c0_20, %c0_21, %c0_22] : memref<10x128x128xbf16, #tpu.memory_space<vmem>>, vector<1x128x128xbf16>
      %44 = vector.shape_cast %43 : vector<1x128x128xbf16> to vector<128x128xbf16>
      %cst = arith.constant dense<0.000000e+00> : vector<128x128xf32>
      %45 = tpu.matmul %42, %44, %cst {dimension_numbers = #tpu.dot_dimension_numbers<[1], [0], [0], [1], [0, 0, 1, 1], [], []>} : vector<128x128xbf16>, vector<128x128xbf16>, vector<128x128xf32> -> vector<128x128xf32>
      %46 = arith.truncf %45 : vector<128x128xf32> to vector<128x128xbf16>
      %47 = arith.index_cast %1 : i32 to index
      %c0_23 = arith.constant 0 : index
      %48 = vector.load %arg7[%47, %c0_23] : memref<128x128xbf16, #tpu.memory_space<vmem>>, vector<128x128xbf16>
      tpu.vector_store %arg7[%47, %c0_23], %46 {strides = array<i32>} : memref<128x128xbf16, #tpu.memory_space<vmem>>, vector<128x128xbf16>,
    } else {
    }
    %c1_i32 = arith.constant 1 : i32
    %5 = arith.cmpi sge, %arg0, %c1_i32 : i32
    %c9_i32 = arith.constant 9 : i32
    %6 = arith.cmpi sle, %arg0, %c9_i32 : i32
    %7 = arith.andi %5, %6 : i1
    %c2_i32 = arith.constant 2 : i32
    %c0_i32_1 = arith.constant 0 : i32
    %8 = arith.cmpi eq, %c2_i32, %c0_i32_1 : i32
    %c1_i32_2 = arith.constant 1 : i32
    %9 = arith.select %8, %c1_i32_2, %c2_i32 : i32
    %10 = arith.remsi %arg0, %9 : i32
    %c0_i32_3 = arith.constant 0 : i32
    %11 = arith.cmpi ne, %10, %c0_i32_3 : i32
    %c0_i32_4 = arith.constant 0 : i32
    %12 = arith.cmpi slt, %10, %c0_i32_4 : i32
    %c0_i32_5 = arith.constant 0 : i32
    %13 = arith.cmpi slt, %9, %c0_i32_5 : i32
    %14 = arith.xori %12, %13 : i1
    %15 = arith.andi %14, %11 : i1
    %16 = arith.addi %10, %9 : i32
    %17 = arith.select %15, %16, %10 : i32
    %c1_i32_6 = arith.constant 1 : i32
    %18 = arith.cmpi eq, %17, %c1_i32_6 : i32
    %19 = arith.andi %7, %18 : i1
    %20 = arith.extui %19 : i1 to i32
    %c0_i32_7 = arith.constant 0 : i32
    %21 = arith.cmpi ne, %20, %c0_i32_7 : i32
    scf.if %21 {
      %c0 = arith.constant 0 : index
      %c0_19 = arith.constant 0 : index
      %42 = vector.load %arg2[%c0, %c0_19] : memref<128x128xbf16, #tpu.memory_space<vmem>>, vector<128x128xbf16>
      %c0_20 = arith.constant 0 : index
      %c0_21 = arith.constant 0 : index
      %43 = vector.load %arg7[%c0_20, %c0_21] : memref<128x128xbf16, #tpu.memory_space<vmem>>, vector<128x128xbf16>
      %cst = arith.constant dense<0.000000e+00> : vector<128x128xf32>
      %44 = tpu.matmul %42, %43, %cst {dimension_numbers = #tpu.dot_dimension_numbers<[1], [0], [0], [1], [0, 0, 1, 1], [], []>} : vector<128x128xbf16>, vector<128x128xbf16>, vector<128x128xf32> -> vector<128x128xf32>
      %c1_i32_22 = arith.constant 1 : i32
      %45 = arith.subi %arg0, %c1_i32_22 : i32
      %46 = arith.index_cast %45 : i32 to index
      %c0_23 = arith.constant 0 : index
      %c0_24 = arith.constant 0 : index
      %47 = vector.load %arg5[%46, %c0_23, %c0_24] : memref<10x1x128xf32, #tpu.memory_space<vmem>>, vector<1x1x128xf32>
      %48 = vector.shape_cast %47 : vector<1x1x128xf32> to vector<1x128xf32>
      %49 = vector.broadcast %48 : vector<1x128xf32> to vector<128x128xf32>
      %50 = arith.addf %44, %49 : vector<128x128xf32>
      %cst_25 = arith.constant 0.000000e+00 : f32
      %51 = vector.broadcast %cst_25 : f32 to vector<128x128xf32>
      %52 = arith.maximumf %50, %51 : vector<128x128xf32>
      %53 = arith.truncf %52 : vector<128x128xf32> to vector<128x128xbf16>
      %54 = arith.index_cast %arg0 : i32 to index
      %c0_26 = arith.constant 0 : index
      %c0_27 = arith.constant 0 : index
      %55 = vector.load %arg4[%54, %c0_26, %c0_27] : memref<10x128x128xbf16, #tpu.memory_space<vmem>>, vector<1x128x128xbf16>
      %56 = vector.shape_cast %55 : vector<1x128x128xbf16> to vector<128x128xbf16>
      %cst_28 = arith.constant dense<0.000000e+00> : vector<128x128xf32>
      %57 = tpu.matmul %53, %56, %cst_28 {dimension_numbers = #tpu.dot_dimension_numbers<[1], [0], [0], [1], [0, 0, 1, 1], [], []>} : vector<128x128xbf16>, vector<128x128xbf16>, vector<128x128xf32> -> vector<128x128xf32>
      %58 = arith.truncf %57 : vector<128x128xf32> to vector<128x128xbf16>
      %59 = arith.index_cast %1 : i32 to index
      %c0_29 = arith.constant 0 : index
      %60 = vector.load %arg8[%59, %c0_29] : memref<128x128xbf16, #tpu.memory_space<vmem>>, vector<128x128xbf16>
      tpu.vector_store %arg8[%59, %c0_29], %58 {strides = array<i32>} : memref<128x128xbf16, #tpu.memory_space<vmem>>, vector<128x128xbf16>,
    } else {
    }
    %c2_i32_8 = arith.constant 2 : i32
    %c0_i32_9 = arith.constant 0 : i32
    %22 = arith.cmpi eq, %c2_i32_8, %c0_i32_9 : i32
    %c1_i32_10 = arith.constant 1 : i32
    %23 = arith.select %22, %c1_i32_10, %c2_i32_8 : i32
    %24 = arith.remsi %arg0, %23 : i32
    %c0_i32_11 = arith.constant 0 : i32
    %25 = arith.cmpi ne, %24, %c0_i32_11 : i32
    %c0_i32_12 = arith.constant 0 : i32
    %26 = arith.cmpi slt, %24, %c0_i32_12 : i32
    %c0_i32_13 = arith.constant 0 : i32
    %27 = arith.cmpi slt, %23, %c0_i32_13 : i32
    %28 = arith.xori %26, %27 : i1
    %29 = arith.andi %28, %25 : i1
    %30 = arith.addi %24, %23 : i32
    %31 = arith.select %29, %30, %24 : i32
    %c0_i32_14 = arith.constant 0 : i32
    %32 = arith.cmpi eq, %31, %c0_i32_14 : i32
    %33 = arith.andi %7, %32 : i1
    %34 = arith.extui %33 : i1 to i32
    %c0_i32_15 = arith.constant 0 : i32
    %35 = arith.cmpi ne, %34, %c0_i32_15 : i32
    scf.if %35 {
      %c0 = arith.constant 0 : index
      %c0_19 = arith.constant 0 : index
      %42 = vector.load %arg2[%c0, %c0_19] : memref<128x128xbf16, #tpu.memory_space<vmem>>, vector<128x128xbf16>
      %c0_20 = arith.constant 0 : index
      %c0_21 = arith.constant 0 : index
      %43 = vector.load %arg8[%c0_20, %c0_21] : memref<128x128xbf16, #tpu.memory_space<vmem>>, vector<128x128xbf16>
      %cst = arith.constant dense<0.000000e+00> : vector<128x128xf32>
      %44 = tpu.matmul %42, %43, %cst {dimension_numbers = #tpu.dot_dimension_numbers<[1], [0], [0], [1], [0, 0, 1, 1], [], []>} : vector<128x128xbf16>, vector<128x128xbf16>, vector<128x128xf32> -> vector<128x128xf32>
      %c1_i32_22 = arith.constant 1 : i32
      %45 = arith.subi %arg0, %c1_i32_22 : i32
      %46 = arith.index_cast %45 : i32 to index
      %c0_23 = arith.constant 0 : index
      %c0_24 = arith.constant 0 : index
      %47 = vector.load %arg5[%46, %c0_23, %c0_24] : memref<10x1x128xf32, #tpu.memory_space<vmem>>, vector<1x1x128xf32>
      %48 = vector.shape_cast %47 : vector<1x1x128xf32> to vector<1x128xf32>
      %49 = vector.broadcast %48 : vector<1x128xf32> to vector<128x128xf32>
      %50 = arith.addf %44, %49 : vector<128x128xf32>
      %cst_25 = arith.constant 0.000000e+00 : f32
      %51 = vector.broadcast %cst_25 : f32 to vector<128x128xf32>
      %52 = arith.maximumf %50, %51 : vector<128x128xf32>
      %53 = arith.truncf %52 : vector<128x128xf32> to vector<128x128xbf16>
      %54 = arith.index_cast %arg0 : i32 to index
      %c0_26 = arith.constant 0 : index
      %c0_27 = arith.constant 0 : index
      %55 = vector.load %arg4[%54, %c0_26, %c0_27] : memref<10x128x128xbf16, #tpu.memory_space<vmem>>, vector<1x128x128xbf16>
      %56 = vector.shape_cast %55 : vector<1x128x128xbf16> to vector<128x128xbf16>
      %cst_28 = arith.constant dense<0.000000e+00> : vector<128x128xf32>
      %57 = tpu.matmul %53, %56, %cst_28 {dimension_numbers = #tpu.dot_dimension_numbers<[1], [0], [0], [1], [0, 0, 1, 1], [], []>} : vector<128x128xbf16>, vector<128x128xbf16>, vector<128x128xf32> -> vector<128x128xf32>
      %58 = arith.truncf %57 : vector<128x128xf32> to vector<128x128xbf16>
      %59 = arith.index_cast %1 : i32 to index
      %c0_29 = arith.constant 0 : index
      %60 = vector.load %arg7[%59, %c0_29] : memref<128x128xbf16, #tpu.memory_space<vmem>>, vector<128x128xbf16>
      tpu.vector_store %arg7[%59, %c0_29], %58 {strides = array<i32>} : memref<128x128xbf16, #tpu.memory_space<vmem>>, vector<128x128xbf16>,
    } else {
    }
    %c10_i32 = arith.constant 10 : i32
    %36 = arith.cmpi slt, %arg0, %c10_i32 : i32
    %37 = arith.extui %36 : i1 to i32
    %c0_i32_16 = arith.constant 0 : i32
    %38 = arith.cmpi ne, %37, %c0_i32_16 : i32
    scf.if %38 {
      %cst = arith.constant 0.000000e+00 : f32
      %42 = vector.broadcast %cst : f32 to vector<128x128xf32>
      %c0 = arith.constant 0 : index
      %c0_19 = arith.constant 0 : index
      %43 = vector.load %arg6[%c0, %c0_19] : memref<128x128xf32, #tpu.memory_space<vmem>>, vector<128x128xf32>
      tpu.vector_store %arg6[%c0, %c0_19], %42 {strides = array<i32>} : memref<128x128xf32, #tpu.memory_space<vmem>>, vector<128x128xf32>,
    } else {
    }
    %c10_i32_17 = arith.constant 10 : i32
    %39 = arith.cmpi eq, %arg0, %c10_i32_17 : i32
    %40 = arith.extui %39 : i1 to i32
    %c0_i32_18 = arith.constant 0 : i32
    %41 = arith.cmpi ne, %40, %c0_i32_18 : i32
    scf.if %41 {
      %c0 = arith.constant 0 : index
      %c0_19 = arith.constant 0 : index
      %42 = vector.load %arg2[%c0, %c0_19] : memref<128x128xbf16, #tpu.memory_space<vmem>>, vector<128x128xbf16>
      %c0_20 = arith.constant 0 : index
      %c0_21 = arith.constant 0 : index
      %43 = vector.load %arg8[%c0_20, %c0_21] : memref<128x128xbf16, #tpu.memory_space<vmem>>, vector<128x128xbf16>
      %cst = arith.constant dense<0.000000e+00> : vector<128x128xf32>
      %44 = tpu.matmul %42, %43, %cst {dimension_numbers = #tpu.dot_dimension_numbers<[1], [0], [0], [1], [0, 0, 1, 1], [], []>} : vector<128x128xbf16>, vector<128x128xbf16>, vector<128x128xf32> -> vector<128x128xf32>
      %c9 = arith.constant 9 : index
      %c0_22 = arith.constant 0 : index
      %c0_23 = arith.constant 0 : index
      %45 = vector.load %arg5[%c9, %c0_22, %c0_23] : memref<10x1x128xf32, #tpu.memory_space<vmem>>, vector<1x1x128xf32>
      %46 = vector.shape_cast %45 : vector<1x1x128xf32> to vector<1x128xf32>
      %47 = vector.broadcast %46 : vector<1x128xf32> to vector<128x128xf32>
      %48 = arith.addf %44, %47 : vector<128x128xf32>
      %c0_24 = arith.constant 0 : index
      %c0_25 = arith.constant 0 : index
      %49 = vector.load %arg6[%c0_24, %c0_25] : memref<128x128xf32, #tpu.memory_space<vmem>>, vector<128x128xf32>
      tpu.vector_store %arg6[%c0_24, %c0_25], %48 {strides = array<i32>} : memref<128x128xf32, #tpu.memory_space<vmem>>, vector<128x128xf32>,
    } else {
    }
    return
  }
  func.func @transform_0(%arg0: i32, %arg1: i32) -> (i32, i32) {
    %c0_i32 = arith.constant 0 : i32
    %c0_i32_0 = arith.constant 0 : i32
    return %arg1, %c0_i32 : i32, i32
  }
  func.func @transform_1(%arg0: i32, %arg1: i32) -> (i32, i32) {
    %c0_i32 = arith.constant 0 : i32
    %c0_i32_0 = arith.constant 0 : i32
    return %arg1, %c0_i32 : i32, i32
  }
  func.func @transform_2(%arg0: i32, %arg1: i32) -> (i32, i32, i32) {
    %c0_i32 = arith.constant 0 : i32
    %c0_i32_0 = arith.constant 0 : i32
    %c0_i32_1 = arith.constant 0 : i32
    %c0_i32_2 = arith.constant 0 : i32
    return %c0_i32, %c0_i32_0, %c0_i32_1 : i32, i32, i32
  }
  func.func @transform_3(%arg0: i32, %arg1: i32) -> (i32, i32, i32) {
    %c0_i32 = arith.constant 0 : i32
    %c0_i32_0 = arith.constant 0 : i32
    %c0_i32_1 = arith.constant 0 : i32
    %c0_i32_2 = arith.constant 0 : i32
    return %c0_i32, %c0_i32_0, %c0_i32_1 : i32, i32, i32
  }
  func.func @transform_4(%arg0: i32, %arg1: i32) -> (i32, i32) {
    %c0_i32 = arith.constant 0 : i32
    %c0_i32_0 = arith.constant 0 : i32
    return %arg1, %c0_i32 : i32, i32
  }
}

</mosaic_0001>

<bundles_post_ra>
// kernel: gcn_forward.1
= control target key start
LH: loop header
LB: loop body
LE: loop exit
PB: predicated region body
PF: predicated region fallthrough
CT: control target
= control target key end

     0   :  { %9 = vsyncpa [#allocation5], 0  ;;  %s3257_s0 = inlined_call_operand.hbm [shape: bf16[128,128], index: 0, kind: input, shape index: {}]   ;;  %s3258_s1 = inlined_call_operand.hbm [shape: bf16[128,128], index: 1, kind: input, shape index: {}]   ;;  %s3259_s2 = inlined_call_operand.hbm [shape: bf16[10,128,128], index: 2, kind: input, shape index: {}]   ;;  %s3260_s3 = inlined_call_operand.hbm [shape: f32[10,1,128], index: 3, kind: input, shape index: {}]   ;;  %s3261_s4 = inlined_call_operand.vmem [shape: f32[128,128], index: 4, kind: output, shape index: {}]  }
   0x1   :  { %10 = vsyncpa [#allocation7], 0 }
   0x2   :  { %11 = vsyncpa [#allocation10], 0  ;;  %s3004_s15 = smov 0   ;;  %s3006_s16 = smov 0  }
   0x3   :  { %s3008_s17 = smov 0  }
   0x4 LB: > { %s2001_s18 = sadd.s32 4294967295, %s2968_s17   ;;  %p2002_p0 = scmp.ge.s32.totalorder %s2968_s17, 1  ;;  %s2968_s17 = sphi %s3008_s17, %s17_s17   ;;  %s2964_s16 = sphi %s3006_s16, %s3268_s16   ;;  %s2960_s15 = sphi %s3004_s15, %s3267_s15  }
   0x5   : > { %p154_p1 = scmp.lt.s32.totalorder %s2968_s17, 12  ;;  %p3022_p2 = scmp.eq.s32.totalorder %s2001_s18, 0 }
   0x6   : > { %s2970_s21 = smov [#allocation6]   ;;  %s29_s24 = sadd.s32 1, %s2964_s16 }
   0x7   : > { %p3026_p3 = pnand %p2002_p0, %p154_p1  ;;  %s185_s22 = sshll.u32 %s2970_s21, 4  ;;  %s186_s22 = int_to_ptr.vmem [resolvable:$true] %s185_s22 }
   0x8   : > { %p3039_p6 = scmp.ge.s32.totalorder %s29_s24, 11  ;;  %s2971_s26 = smov [#allocation4]  }
   0x9   : > { %p2696_p4 = pneg %p3026_p3  ;;  %s169_s27 = sshll.u32 %s2971_s26, 4  ;;  %s170_s27 = int_to_ptr.vmem [resolvable:$true] %s169_s27 }
   0xa   : > { %s2841_s28 = scalar_lea.vmem %s186_s22, 1024  ;;  %p2849_p11 = scmp.lt.s32.totalorder %s186_s22, %s186_s22 }
   0xb   : > { %p3034_p5 = pnand %p3022_p2, %p2696_p4  ;;  %p2842_p8 = scmp.ne.s32.totalorder %s186_s22, %s2841_s28 }
   0xc   : > { %p2850_p12 = scmp.lt.s32.totalorder %s2841_s28, %s2841_s28 }
   0xd   : > { %p2832_p7 = pneg %p3034_p5 }
   0xe   : > { %p2851_p13 = por %p2850_p12, %p2849_p11 }
   0xf   : > { %p2844_p9 = pnand %p2842_p8, %p2832_p7 }
  0x11   : > { %p2845_p10 = pneg %p2844_p9 }
  0x13   : > { %p2852_p0 = pnand %p2851_p13, %p2845_p10 }
  0x15   : > { %2855 = shalt.err (!%p2852_p0)
}
  0x16   : > { %s2972_s29 = smov 64   ;;  %s2973_s30 = smov 4  }
  0x17   : > { %2702 = dma.hbm_to_vmem [thread:$0]  (!%p3034_p5), %s3258_s1, 1024, %s186_s22, [#allocation7], %s2972_s29, %s2972_s29, %s2973_s30  }
  0x18   : > { %s3270_s24 = smov (%p3039_p6, %s29_s24), 0  ;;  %s2867_s7 = scalar_lea.vmem %s170_s27, 1024 }
  0x19   : > { %p2868_p1 = scmp.ne.s32.totalorder %s170_s27, %s2867_s7  ;;  %p2875_p9 = scmp.lt.s32.totalorder %s170_s27, %s170_s27 }
  0x1a   : > { %p2876_p10 = scmp.lt.s32.totalorder %s2867_s7, %s2867_s7 }
  0x1b   : > { %p2870_p4 = pnand %p2868_p1, %p2832_p7 }
  0x1c   : > { %p2877_p11 = por %p2876_p10, %p2875_p9 }
  0x1d   : > { %p2871_p8 = pneg %p2870_p4 }
  0x1f   : > { %p2878_p12 = pnand %p2877_p11, %p2871_p8 }
  0x21   : > { %2881 = shalt.err (!%p2878_p12)
}
  0x22   : > { %2699 = dma.hbm_to_vmem [thread:$0]  (!%p3034_p5), %s3257_s0, 1024, %s170_s27, [#allocation5], %s2972_s29, %s2972_s29, %s2973_s30  }
  0x23   : > { %s2974_s10 = smov [#allocation8]   ;;  %s2975_s12 = smov [#allocation9]  }
  0x24   : > { %s198_s11 = sshll.u32 %s2974_s10, 4  ;;  %s211_s13 = sshll.u32 %s2975_s12, 4  ;;  %s199_s11 = int_to_ptr.vmem [resolvable:$true] %s198_s11  ;;  %s212_s13 = int_to_ptr.vmem [resolvable:$true] %s211_s13 }
  0x25   : > { %s2893_s14 = scalar_lea.vmem %s199_s11, 10240  ;;  %p2901_p1 = scmp.lt.s32.totalorder %s199_s11, %s199_s11 }
  0x26   : > { %p2894_p6 = scmp.ne.s32.totalorder %s199_s11, %s2893_s14  ;;  %p2902_p4 = scmp.lt.s32.totalorder %s2893_s14, %s2893_s14 }
  0x28   : > { %p2896_p13 = pnand %p2894_p6, %p2832_p7  ;;  %p2903_p8 = por %p2902_p4, %p2901_p1 }
  0x2a   : > { %p2897_p0 = pneg %p2896_p13 }
  0x2c   : > { %p2904_p9 = pnand %p2903_p8, %p2897_p0 }
  0x2e   : > { %2907 = shalt.err (!%p2904_p9)
}
  0x2f   : > { %2705 = dma.hbm_to_vmem [thread:$0]  (!%p3034_p5), %s3259_s2, 10240, %s199_s11, [#allocation7], %s2972_s29, %s2972_s29, %s2973_s30  }
  0x30   : > { %s2919_s22 = scalar_lea.vmem %s212_s13, 160  ;;  %p2927_p6 = scmp.lt.s32.totalorder %s212_s13, %s212_s13 }
  0x31   : > { %p2920_p10 = scmp.ne.s32.totalorder %s212_s13, %s2919_s22  ;;  %p2928_p13 = scmp.lt.s32.totalorder %s2919_s22, %s2919_s22 }
  0x33   : > { %p2922_p11 = pnand %p2920_p10, %p2832_p7  ;;  %p2929_p0 = por %p2928_p13, %p2927_p6 }
  0x35   : > { %p2923_p12 = pneg %p2922_p11 }
  0x37   : > { %p2930_p1 = pnand %p2929_p0, %p2923_p12 }
  0x39   : > { %2933 = shalt.err (!%p2930_p1)
}
  0x3a   : > { %s2976_s25 = smov 16   ;;  %s2977_s26 = smov 1  }
  0x3b   : > { %2708 = dma.hbm_to_vmem [thread:$0]  (!%p3034_p5), %s3260_s3, 160, %s212_s13, [#allocation10], %s2976_s25, %s2976_s25, %s2977_s26  }
  0x3c   : > { %227 = sbr.rel (%p3026_p3) target bundleno = 1543 (0x607), region = 36 }
  0x41   : > { %2947 = dma.done.wait (%p3022_p2), [#allocation5], 1024  }
  0x42   : > { %2949 = vsyncadd (%p3022_p2), [#allocation5], 4294966272 }
  0x43   : > { %2951 = dma.done.wait (%p3022_p2), [#allocation7], 11264  }
  0x44   : > { %2953 = vsyncadd (%p3022_p2), [#allocation7], 4294956032 }
  0x45   : > { %2955 = dma.done.wait (%p3022_p2), [#allocation10], 160  }
  0x46   : > { %2957 = vsyncadd (%p3022_p2), [#allocation10], 4294967136  ;;  %p2012_p3 = scmp.ne.s32.totalorder %s2960_s15, 0 }
  0x48   : > { %273 = sbr.rel (%p2012_p3) target bundleno = 320 (0x140), region = 56 }
  0x4d   : > { %v2750_v0 = vld [vmem:[#allocation8 + $0x38] sm:$0xff]   ;;  %v2751_v1 = vld [vmem:[#allocation8 + $0x30] sm:$0xff]   ;;  %v2752_v2 = vld [vmem:[#allocation8 + $0x28] sm:$0xff]  }
  0x4e   : > { %2456 = vmatprep.subr.bf16.mxu0 %v2750_v0  ;;  %2648 = vmatprep.subr.bf16.mxu1 %v2750_v0  ;;  %v2753_v3 = vld [vmem:[#allocation8 + $0x20] sm:$0xff]   ;;  %v2754_v6 = vld [vmem:[#allocation8 + $0x18] sm:$0xff]   ;;  %v2755_v7 = vld [vmem:[#allocation8 + $0x10] sm:$0xff]  }
  0x4f   : > { %2457 = vmatpush3.bf16.msra.mxu0 %v2750_v0  ;;  %2656 = vmatpush3.bf16.msra.mxu1 %v2750_v0  ;;  %v2758_v4 = vld [vmem:[#allocation6] sm:$0xff]   ;;  %v2756_v8 = vld [vmem:[#allocation8 + $0x8] sm:$0xff]   ;;  %v2762_v12 = vld [vmem:[#allocation6 + $0x10] sm:$0xff]  }
  0x50   : > { %2458 = vmatprep.subr.bf16.mxu0 %v2751_v1  ;;  %2649 = vmatprep.subr.bf16.mxu1 %v2751_v1  ;;  %v2759_v5 = vld [vmem:[#allocation6 + $0x20] sm:$0xff]   ;;  %v2760_v10 = vld [vmem:[#allocation6 + $0x8] sm:$0xff]   ;;  %v2763_v13 = vld [vmem:[#allocation6 + $0x30] sm:$0xff]  }
  0x51   : > { %2472 = vmatprep.mubr.bf16.mxu0 %v2758_v4  ;;  %2480 = vmatprep.mubr.bf16.mxu1 %v2759_v5  ;;  %v2757_v9 = vld [vmem:[#allocation8] sm:$0xff]   ;;  %v2761_v11 = vld [vmem:[#allocation6 + $0x28] sm:$0xff]   ;;  %v2764_v14 = vld [vmem:[#allocation6 + $0x18] sm:$0xff]  }
  0x52   : > { %v2765_v15 = vld [vmem:[#allocation6 + $0x38] sm:$0xff]  }
  0x53   : > { %2459 = vmatpush3.bf16.msra.mxu0 %v2751_v1  ;;  %2657 = vmatpush3.bf16.msra.mxu1 %v2751_v1 }
  0x54   : > { %2460 = vmatprep.subr.bf16.mxu0 %v2752_v2  ;;  %2650 = vmatprep.subr.bf16.mxu1 %v2752_v2 }
  0x57   : > { %2461 = vmatpush3.bf16.msra.mxu0 %v2752_v2  ;;  %2658 = vmatpush3.bf16.msra.mxu1 %v2752_v2 }
  0x58   : > { %2462 = vmatprep.subr.bf16.mxu0 %v2753_v3  ;;  %2651 = vmatprep.subr.bf16.mxu1 %v2753_v3 }
  0x5b   : > { %2463 = vmatpush3.bf16.msra.mxu0 %v2753_v3  ;;  %2659 = vmatpush3.bf16.msra.mxu1 %v2753_v3 }
  0x5c   : > { %2464 = vmatprep.subr.bf16.mxu0 %v2754_v6  ;;  %2652 = vmatprep.subr.bf16.mxu1 %v2754_v6 }
  0x5f   : > { %2465 = vmatpush3.bf16.msra.mxu0 %v2754_v6  ;;  %2660 = vmatpush3.bf16.msra.mxu1 %v2754_v6 }
  0x60   : > { %2466 = vmatprep.subr.bf16.mxu0 %v2755_v7  ;;  %2653 = vmatprep.subr.bf16.mxu1 %v2755_v7 }
  0x63   : > { %2467 = vmatpush3.bf16.msra.mxu0 %v2755_v7  ;;  %2661 = vmatpush3.bf16.msra.mxu1 %v2755_v7 }
  0x64   : > { %2468 = vmatprep.subr.bf16.mxu0 %v2756_v8  ;;  %2654 = vmatprep.subr.bf16.mxu1 %v2756_v8 }
  0x67   : > { %2469 = vmatpush3.bf16.msra.mxu0 %v2756_v8  ;;  %2662 = vmatpush3.bf16.msra.mxu1 %v2756_v8 }
  0x68   : > { %2470 = vmatprep.subr.bf16.mxu0 %v2757_v9  ;;  %2655 = vmatprep.subr.bf16.mxu1 %v2757_v9 }
  0x6b   : > { %2471 = vmatpush3.bf16.msra.mxu0 %v2757_v9  ;;  %2663 = vmatpush3.bf16.msra.mxu1 %v2757_v9 }
  0x6e   : > { %2473 = vmatmul.mubr.bf16.vlgmr.msra.gmra.mxu0 %v2760_v10  ;;  %2481 = vmatmul.mubr.bf16.vlgmr.msra.gmra.mxu1 %v2761_v11 }
  0x6f   : > { %2476 = vmatprep.mubr.bf16.mxu0 %v2762_v12  ;;  %2484 = vmatprep.mubr.bf16.mxu1 %v2763_v13 }
  0x76   : > { %2477 = vmatmul.mubr.bf16.gmra.mxu0 %v2764_v14  ;;  %2485 = vmatmul.mubr.bf16.gmra.mxu1 %v2765_v15 }
 0x12e   : > { %v2474_v16 = vpop.f32.mrf.mxu0  ;;  %v2482_v17 = vpop.f32.mrf.mxu1 }
 0x130   : > { %v436_v18 = vpop.f32.mrf.mxu0  ;;  %v468_v19 = vpop.f32.mrf.mxu1 }
 0x132   : > { %v2475_v20 = vpop.f32.mrf.mxu0  ;;  %v2483_v21 = vpop.f32.mrf.mxu1 }
 0x133   : > { %v2227_v22 = vpack.c.bf16 %v2475_v20, %v2474_v16  ;;  %v2247_v23 = vpack.c.bf16 %v2483_v21, %v2482_v17 }
 0x134   : > { %v439_v24 = vpop.f32.mrf.mxu0  ;;  %v471_v25 = vpop.f32.mrf.mxu1 }
 0x135   : > { %2339 = vst [vmem:[#allocation2 + $0x8] sm:$0xff] %v2227_v22   ;;  %2343 = vst [vmem:[#allocation2 + $0x28] sm:$0xff] %v2247_v23   ;;  %v2222_v26 = vpack.c.bf16 %v439_v24, %v436_v18  ;;  %v2242_v27 = vpack.c.bf16 %v471_v25, %v468_v19 }
 0x136   : > { %v2478_v28 = vpop.f32.mrf.mxu0  ;;  %v2486_v29 = vpop.f32.mrf.mxu1 }
 0x137   : > { %2223 = vst [vmem:[#allocation2] sm:$0xff] %v2222_v26   ;;  %2342 = vst [vmem:[#allocation2 + $0x20] sm:$0xff] %v2242_v27  }
 0x138   : > { %v452_v30 = vpop.f32.mrf.mxu0  ;;  %v484_v31 = vpop.f32.mrf.mxu1 }
 0x13a   : > { %v2479_v32 = vpop.f32.mrf.mxu0  ;;  %v2487_v33 = vpop.f32.mrf.mxu1 }
 0x13b   : > { %v2237_v34 = vpack.c.bf16 %v2479_v32, %v2478_v28  ;;  %v2257_v35 = vpack.c.bf16 %v2487_v33, %v2486_v29 }
 0x13c   : > { %v455_v36 = vpop.f32.mrf.mxu0  ;;  %v487_v37 = vpop.f32.mrf.mxu1 }
 0x13d   : > { %2341 = vst [vmem:[#allocation2 + $0x18] sm:$0xff] %v2237_v34   ;;  %2345 = vst [vmem:[#allocation2 + $0x38] sm:$0xff] %v2257_v35   ;;  %v2232_v38 = vpack.c.bf16 %v455_v36, %v452_v30  ;;  %v2252_v39 = vpack.c.bf16 %v487_v37, %v484_v31 }
 0x13f   : > { %2340 = vst [vmem:[#allocation2 + $0x10] sm:$0xff] %v2232_v38   ;;  %2344 = vst [vmem:[#allocation2 + $0x30] sm:$0xff] %v2252_v39  }
 0x140 PF: > { %p583_p2 = scmp.ge.s32.totalorder %s2960_s15, 1  ;;  %p584_p5 = scmp.le.s32.totalorder %s2960_s15, 9 }
 0x141   : > { %p587_p7 = scmp.lt.s32.totalorder %s2960_s15, 0  ;;  %s588_s19 = ssub.s32 0, %s2960_s15 }
 0x142   : > { %s2045_s20 = smin.u32 %s2960_s15, %s588_s19  ;;  %p3110_p4 = pnand %p584_p5, %p583_p2 }
 0x143   : > { %s590_s23 = sand.u32 1, %s2045_s20  }
 0x144   : > { %s591_s30 = ssub.s32 0, %s590_s23  ;;  %p586_p9 = pneg %p3110_p4 }
 0x145   : > { %s3272_s30 = smov (!%p587_p7, %s591_s30), %s590_s23 }
 0x146   : > { %p2047_p8 = scmp.lt.s32.totalorder %s3272_s30, 0  ;;  %s597_s5 = sadd.s32 2, %s3272_s30 }
 0x148   : > { %s3274_s5 = smov (!%p2047_p8, %s597_s5), %s3272_s30 }
 0x149   : > { %p599_p10 = scmp.eq.s32.totalorder %s3274_s5, 1 }
 0x14b   : > { %p600_p11 = pnand %p599_p10, %p586_p9 }
 0x14c   : > { %s2181_s6 = sshll.u32 (!%p600_p11), %s2960_s15, 6  ;;  %s2177_s8 = scalar_lea.vmem (!%p600_p11), [#allocation9], %s2960_s15 }
 0x14d   : > { %603 = sbr.rel (%p600_p11) target bundleno = 803 (0x323), region = 60  ;;  %s3123_s7 = scalar_lea.vmem (!%p600_p11), [#allocation8], %s2181_s6 }
 0x152   : > { %v2766_v40 = vld [vmem:[#allocation2 + $0x38] sm:$0xff]   ;;  %v2767_v41 = vld [vmem:[#allocation2 + $0x30] sm:$0xff]   ;;  %v2768_v42 = vld [vmem:[#allocation2 + $0x28] sm:$0xff]  }
 0x153   : > { %2488 = vmatprep.subr.bf16.mxu0 %v2766_v40  ;;  %v2769_v43 = vld [vmem:[#allocation2 + $0x20] sm:$0xff]   ;;  %v2770_v45 = vld [vmem:[#allocation2 + $0x18] sm:$0xff]   ;;  %v2771_v46 = vld [vmem:[#allocation2 + $0x10] sm:$0xff]  }
 0x154   : > { %2489 = vmatpush3.bf16.msra.mxu0 %v2766_v40  ;;  %v2774_v44 = vld [vmem:[#allocation4] sm:$0xff]   ;;  %v2782_v47 = vld [vmem:[%s3123_s7 + $0x38] sm:$0xff]   ;;  %v2783_v48 = vld [vmem:[%s3123_s7 + $0x30] sm:$0xff]  }
 0x155   : > { %2490 = vmatprep.subr.bf16.mxu0 %v2767_v41  ;;  %2504 = vmatprep.mubr.bf16.mxu0 %v2774_v44  ;;  %v2772_v49 = vld [vmem:[#allocation2 + $0x8] sm:$0xff]   ;;  %v2773_v51 = vld [vmem:[#allocation2] sm:$0xff]   ;;  %v2786_v53 = vld [vmem:[%s3123_s7 + $0x18] sm:$0xff]  }
 0x156   : > { %2520 = vmatprep.subr.bf16.mxu1 %v2782_v47  ;;  %v2784_v50 = vld [vmem:[%s3123_s7 + $0x28] sm:$0xff]   ;;  %v2785_v52 = vld [vmem:[%s3123_s7 + $0x20] sm:$0xff]   ;;  %v2776_v55 = vld [vmem:[#allocation4 + $0x10] sm:$0xff]  }
 0x157   : > { %2521 = vmatpush3.bf16.msra.mxu1 %v2782_v47  ;;  %v2775_v54 = vld [vmem:[#allocation4 + $0x8] sm:$0xff]   ;;  %v2777_v56 = vld [vmem:[#allocation4 + $0x18] sm:$0xff]   ;;  %v2778_v57 = vld [vmem:[#allocation4 + $0x20] sm:$0xff]  }
 0x158   : > { %2491 = vmatpush3.bf16.msra.mxu0 %v2767_v41  ;;  %2522 = vmatprep.subr.bf16.mxu1 %v2783_v48  ;;  %v2779_v58 = vld [vmem:[#allocation4 + $0x28] sm:$0xff]   ;;  %v2780_v59 = vld [vmem:[#allocation4 + $0x30] sm:$0xff]   ;;  %v2781_v60 = vld [vmem:[#allocation4 + $0x38] sm:$0xff]  }
 0x159   : > { %2492 = vmatprep.subr.bf16.mxu0 %v2768_v42  ;;  %v2787_v61 = vld [vmem:[%s3123_s7 + $0x10] sm:$0xff]   ;;  %v2788_v62 = vld [vmem:[%s3123_s7 + $0x8] sm:$0xff]   ;;  %v2789_v63 = vld [vmem:[%s3123_s7] sm:$0xff]  }
 0x15a   : > { %v2180_v2 = vld [vmem:[%s2177_s8 - $0x1] ss:$0 sm:$0xff] }
 0x15b   : > { %2523 = vmatpush3.bf16.msra.mxu1 %v2783_v48 }
 0x15c   : > { %2493 = vmatpush3.bf16.msra.mxu0 %v2768_v42  ;;  %2524 = vmatprep.subr.bf16.mxu1 %v2784_v50 }
 0x15d   : > { %2494 = vmatprep.subr.bf16.mxu0 %v2769_v43 }
 0x15f   : > { %2525 = vmatpush3.bf16.msra.mxu1 %v2784_v50 }
 0x160   : > { %2495 = vmatpush3.bf16.msra.mxu0 %v2769_v43  ;;  %2526 = vmatprep.subr.bf16.mxu1 %v2785_v52 }
 0x161   : > { %2496 = vmatprep.subr.bf16.mxu0 %v2770_v45 }
 0x163   : > { %2527 = vmatpush3.bf16.msra.mxu1 %v2785_v52 }
 0x164   : > { %2497 = vmatpush3.bf16.msra.mxu0 %v2770_v45  ;;  %2528 = vmatprep.subr.bf16.mxu1 %v2786_v53 }
 0x165   : > { %2498 = vmatprep.subr.bf16.mxu0 %v2771_v46 }
 0x167   : > { %2529 = vmatpush3.bf16.msra.mxu1 %v2786_v53 }
 0x168   : > { %2499 = vmatpush3.bf16.msra.mxu0 %v2771_v46  ;;  %2530 = vmatprep.subr.bf16.mxu1 %v2787_v61 }
 0x169   : > { %2500 = vmatprep.subr.bf16.mxu0 %v2772_v49 }
 0x16b   : > { %2531 = vmatpush3.bf16.msra.mxu1 %v2787_v61 }
 0x16c   : > { %2501 = vmatpush3.bf16.msra.mxu0 %v2772_v49  ;;  %2532 = vmatprep.subr.bf16.mxu1 %v2788_v62 }
 0x16d   : > { %2502 = vmatprep.subr.bf16.mxu0 %v2773_v51 }
 0x16f   : > { %2533 = vmatpush3.bf16.msra.mxu1 %v2788_v62 }
 0x170   : > { %2503 = vmatpush3.bf16.msra.mxu0 %v2773_v51  ;;  %2534 = vmatprep.subr.bf16.mxu1 %v2789_v63 }
 0x173   : > { %2505 = vmatmul.mubr.bf16.vlgmr.msra.gmra.mxu0 %v2775_v54  ;;  %2535 = vmatpush3.bf16.msra.mxu1 %v2789_v63 }
 0x174   : > { %2508 = vmatprep.mubr.bf16.mxu0 %v2776_v55 }
 0x17b   : > { %2509 = vmatmul.mubr.bf16.gmra.mxu0 %v2777_v56 }
 0x17c   : > { %2512 = vmatprep.mubr.bf16.mxu0 %v2778_v57 }
 0x183   : > { %2513 = vmatmul.mubr.bf16.gmra.mxu0 %v2779_v58 }
 0x184   : > { %2516 = vmatprep.mubr.bf16.mxu0 %v2780_v59 }
 0x18b   : > { %2517 = vmatmul.mubr.bf16.gmra.mxu0 %v2781_v60 }
 0x233   : > { %v2506_v0 = vpop.f32.mrf.mxu0 }
 0x234   : > { %v784_v6 = vadd.f32 %v2506_v0, %v2180_v2 }
 0x235   : > { %v775_v1 = vpop.f32.mrf.mxu0 }
 0x236   : > { %v776_v4 = vadd.f32 %v2180_v2, %v775_v1  ;;  %v840_v13 = vmax.f32 %v784_v6, 0.0 }
 0x237   : > { %v2507_v3 = vpop.f32.mrf.mxu0 }
 0x238   : > { %v787_v5 = vadd.f32 %v2507_v3, %v2180_v2  ;;  %v838_v11 = vmax.f32 %v776_v4, 0.0 }
 0x239   : > { %v778_v7 = vpop.f32.mrf.mxu0 }
 0x23a   : > { %v779_v8 = vadd.f32 %v2180_v2, %v778_v7  ;;  %v841_v9 = vmax.f32 %v787_v5, 0.0 }
 0x23b   : > { %v2510_v10 = vpop.f32.mrf.mxu0 }
 0x23c   : > { %v839_v12 = vmax.f32 %v779_v8, 0.0  ;;  %v855_v16 = vpack.c.bf16 %v841_v9, %v840_v13  ;;  %v800_v20 = vadd.f32 %v2510_v10, %v2180_v2 }
 0x23d   : > { %v791_v14 = vpop.f32.mrf.mxu0 }
 0x23e   : > { %v854_v15 = vpack.c.bf16 %v839_v12, %v838_v11  ;;  %v792_v18 = vadd.f32 %v2180_v2, %v791_v14  ;;  %v844_v27 = vmax.f32 %v800_v20, 0.0 }
 0x23f   : > { %v2511_v17 = vpop.f32.mrf.mxu0 }
 0x240   : > { %v803_v19 = vadd.f32 %v2511_v17, %v2180_v2  ;;  %2536 = vmatprep.mubr.bf16.mxu1 %v854_v15  ;;  %v842_v25 = vmax.f32 %v792_v18, 0.0 }
 0x241   : > { %v794_v21 = vpop.f32.mrf.mxu0  ;;  %2537 = vmatmul.mubr.bf16.vlgmr.msra.gmra.mxu1 %v855_v16 }
 0x242   : > { %v795_v22 = vadd.f32 %v2180_v2, %v794_v21  ;;  %v845_v23 = vmax.f32 %v803_v19, 0.0 }
 0x243   : > { %v2514_v24 = vpop.f32.mrf.mxu0 }
 0x244   : > { %v843_v26 = vmax.f32 %v795_v22, 0.0  ;;  %v857_v30 = vpack.c.bf16 %v845_v23, %v844_v27  ;;  %v816_v34 = vadd.f32 %v2514_v24, %v2180_v2 }
 0x245   : > { %v807_v28 = vpop.f32.mrf.mxu0 }
 0x246   : > { %v856_v29 = vpack.c.bf16 %v843_v26, %v842_v25  ;;  %v808_v32 = vadd.f32 %v2180_v2, %v807_v28  ;;  %v848_v41 = vmax.f32 %v816_v34, 0.0 }
 0x247   : > { %v2515_v31 = vpop.f32.mrf.mxu0 }
 0x248   : > { %v819_v33 = vadd.f32 %v2515_v31, %v2180_v2  ;;  %2540 = vmatprep.mubr.bf16.mxu1 %v856_v29  ;;  %v846_v39 = vmax.f32 %v808_v32, 0.0 }
 0x249   : > { %v810_v35 = vpop.f32.mrf.mxu0  ;;  %2541 = vmatmul.mubr.bf16.gmra.mxu1 %v857_v30 }
 0x24a   : > { %v811_v36 = vadd.f32 %v2180_v2, %v810_v35  ;;  %v849_v37 = vmax.f32 %v819_v33, 0.0 }
 0x24b   : > { %v2518_v38 = vpop.f32.mrf.mxu0 }
 0x24c   : > { %v847_v40 = vmax.f32 %v811_v36, 0.0  ;;  %v859_v44 = vpack.c.bf16 %v849_v37, %v848_v41  ;;  %v832_v48 = vadd.f32 %v2518_v38, %v2180_v2 }
 0x24d   : > { %v823_v42 = vpop.f32.mrf.mxu0 }
 0x24e   : > { %v858_v43 = vpack.c.bf16 %v847_v40, %v846_v39  ;;  %v824_v46 = vadd.f32 %v2180_v2, %v823_v42  ;;  %v852_v54 = vmax.f32 %v832_v48, 0.0 }
 0x24f   : > { %v2519_v45 = vpop.f32.mrf.mxu0 }
 0x250   : > { %v835_v47 = vadd.f32 %v2519_v45, %v2180_v2  ;;  %2544 = vmatprep.mubr.bf16.mxu1 %v858_v43  ;;  %v850_v52 = vmax.f32 %v824_v46, 0.0 }
 0x251   : > { %v826_v49 = vpop.f32.mrf.mxu0  ;;  %2545 = vmatmul.mubr.bf16.gmra.mxu1 %v859_v44 }
 0x252   : > { %v827_v50 = vadd.f32 %v2180_v2, %v826_v49  ;;  %v853_v51 = vmax.f32 %v835_v47, 0.0 }
 0x254   : > { %v851_v53 = vmax.f32 %v827_v50, 0.0  ;;  %v861_v56 = vpack.c.bf16 %v853_v51, %v852_v54 }
 0x256   : > { %v860_v55 = vpack.c.bf16 %v851_v53, %v850_v52 }
 0x258   : > { %2548 = vmatprep.mubr.bf16.mxu1 %v860_v55 }
 0x259   : > { %2549 = vmatmul.mubr.bf16.gmra.mxu1 %v861_v56 }
 0x301   : > { %v2538_v57 = vpop.f32.mrf.mxu1 }
 0x303   : > { %v963_v58 = vpop.f32.mrf.mxu1 }
 0x305   : > { %v2539_v59 = vpop.f32.mrf.mxu1 }
 0x306   : > { %v2267_v60 = vpack.c.bf16 %v2539_v59, %v2538_v57 }
 0x307   : > { %v966_v61 = vpop.f32.mrf.mxu1 }
 0x308   : > { %2346 = vst [vmem:[#allocation3 + $0x8] sm:$0xff] %v2267_v60   ;;  %v2262_v62 = vpack.c.bf16 %v966_v61, %v963_v58 }
 0x309   : > { %v2542_v63 = vpop.f32.mrf.mxu1 }
 0x30a   : > { %2263 = vst [vmem:[#allocation3] sm:$0xff] %v2262_v62  }
 0x30b   : > { %v979_v0 = vpop.f32.mrf.mxu1 }
 0x30d   : > { %v2543_v1 = vpop.f32.mrf.mxu1 }
 0x30e   : > { %v2277_v2 = vpack.c.bf16 %v2543_v1, %v2542_v63 }
 0x30f   : > { %v982_v3 = vpop.f32.mrf.mxu1 }
 0x310   : > { %2348 = vst [vmem:[#allocation3 + $0x18] sm:$0xff] %v2277_v2   ;;  %v2272_v4 = vpack.c.bf16 %v982_v3, %v979_v0 }
 0x311   : > { %v2546_v5 = vpop.f32.mrf.mxu1 }
 0x312   : > { %2347 = vst [vmem:[#allocation3 + $0x10] sm:$0xff] %v2272_v4  }
 0x313   : > { %v995_v6 = vpop.f32.mrf.mxu1 }
 0x315   : > { %v2547_v7 = vpop.f32.mrf.mxu1 }
 0x316   : > { %v2287_v8 = vpack.c.bf16 %v2547_v7, %v2546_v5 }
 0x317   : > { %v998_v9 = vpop.f32.mrf.mxu1 }
 0x318   : > { %2350 = vst [vmem:[#allocation3 + $0x28] sm:$0xff] %v2287_v8   ;;  %v2282_v10 = vpack.c.bf16 %v998_v9, %v995_v6 }
 0x319   : > { %v2550_v11 = vpop.f32.mrf.mxu1 }
 0x31a   : > { %2349 = vst [vmem:[#allocation3 + $0x20] sm:$0xff] %v2282_v10  }
 0x31b   : > { %v1011_v12 = vpop.f32.mrf.mxu1 }
 0x31d   : > { %v2551_v13 = vpop.f32.mrf.mxu1 }
 0x31e   : > { %v2297_v14 = vpack.c.bf16 %v2551_v13, %v2550_v11 }
 0x31f   : > { %v1014_v15 = vpop.f32.mrf.mxu1 }
 0x320   : > { %2352 = vst [vmem:[#allocation3 + $0x38] sm:$0xff] %v2297_v14   ;;  %v2292_v16 = vpack.c.bf16 %v1014_v15, %v1011_v12 }
 0x322   : > { %2351 = vst [vmem:[#allocation3 + $0x30] sm:$0xff] %v2292_v16  }
 0x323 PF: > { %p1110_p12 = scmp.eq.s32.totalorder %s3274_s5, 0 }
 0x325   : > { %p1111_p6 = pnand %p1110_p12, %p586_p9 }
 0x326   : > { %s2202_s9 = sshll.u32 (!%p1111_p6), %s2960_s15, 6  ;;  %s2198_s11 = scalar_lea.vmem (!%p1111_p6), [#allocation9], %s2960_s15 }
 0x327   : > { %1114 = sbr.rel (%p1111_p6) target bundleno = 1277 (0x4fd), region = 64  ;;  %s3139_s10 = scalar_lea.vmem (!%p1111_p6), [#allocation8], %s2202_s9 }
 0x32c   : > { %v2790_v17 = vld [vmem:[#allocation3 + $0x38] sm:$0xff]   ;;  %v2791_v18 = vld [vmem:[#allocation3 + $0x30] sm:$0xff]   ;;  %v2792_v19 = vld [vmem:[#allocation3 + $0x28] sm:$0xff]  }
 0x32d   : > { %2552 = vmatprep.subr.bf16.mxu0 %v2790_v17  ;;  %v2793_v20 = vld [vmem:[#allocation3 + $0x20] sm:$0xff]   ;;  %v2794_v22 = vld [vmem:[#allocation3 + $0x18] sm:$0xff]   ;;  %v2795_v23 = vld [vmem:[#allocation3 + $0x10] sm:$0xff]  }
 0x32e   : > { %2553 = vmatpush3.bf16.msra.mxu0 %v2790_v17  ;;  %v2798_v21 = vld [vmem:[#allocation4] sm:$0xff]   ;;  %v2806_v24 = vld [vmem:[%s3139_s10 + $0x38] sm:$0xff]   ;;  %v2807_v25 = vld [vmem:[%s3139_s10 + $0x30] sm:$0xff]  }
 0x32f   : > { %2554 = vmatprep.subr.bf16.mxu0 %v2791_v18  ;;  %2568 = vmatprep.mubr.bf16.mxu0 %v2798_v21  ;;  %v2796_v26 = vld [vmem:[#allocation3 + $0x8] sm:$0xff]   ;;  %v2797_v28 = vld [vmem:[#allocation3] sm:$0xff]   ;;  %v2810_v30 = vld [vmem:[%s3139_s10 + $0x18] sm:$0xff]  }
 0x330   : > { %2584 = vmatprep.subr.bf16.mxu1 %v2806_v24  ;;  %v2808_v27 = vld [vmem:[%s3139_s10 + $0x28] sm:$0xff]   ;;  %v2809_v29 = vld [vmem:[%s3139_s10 + $0x20] sm:$0xff]   ;;  %v2800_v32 = vld [vmem:[#allocation4 + $0x10] sm:$0xff]  }
 0x331   : > { %2585 = vmatpush3.bf16.msra.mxu1 %v2806_v24  ;;  %v2799_v31 = vld [vmem:[#allocation4 + $0x8] sm:$0xff]   ;;  %v2801_v33 = vld [vmem:[#allocation4 + $0x18] sm:$0xff]   ;;  %v2802_v34 = vld [vmem:[#allocation4 + $0x20] sm:$0xff]  }
 0x332   : > { %2555 = vmatpush3.bf16.msra.mxu0 %v2791_v18  ;;  %2586 = vmatprep.subr.bf16.mxu1 %v2807_v25  ;;  %v2803_v35 = vld [vmem:[#allocation4 + $0x28] sm:$0xff]   ;;  %v2804_v36 = vld [vmem:[#allocation4 + $0x30] sm:$0xff]   ;;  %v2805_v37 = vld [vmem:[#allocation4 + $0x38] sm:$0xff]  }
 0x333   : > { %2556 = vmatprep.subr.bf16.mxu0 %v2792_v19  ;;  %v2811_v38 = vld [vmem:[%s3139_s10 + $0x10] sm:$0xff]   ;;  %v2812_v39 = vld [vmem:[%s3139_s10 + $0x8] sm:$0xff]   ;;  %v2813_v40 = vld [vmem:[%s3139_s10] sm:$0xff]  }
 0x334   : > { %v2201_v43 = vld [vmem:[%s2198_s11 - $0x1] ss:$0 sm:$0xff] }
 0x335   : > { %2587 = vmatpush3.bf16.msra.mxu1 %v2807_v25 }
 0x336   : > { %2557 = vmatpush3.bf16.msra.mxu0 %v2792_v19  ;;  %2588 = vmatprep.subr.bf16.mxu1 %v2808_v27 }
 0x337   : > { %2558 = vmatprep.subr.bf16.mxu0 %v2793_v20 }
 0x339   : > { %2589 = vmatpush3.bf16.msra.mxu1 %v2808_v27 }
 0x33a   : > { %2559 = vmatpush3.bf16.msra.mxu0 %v2793_v20  ;;  %2590 = vmatprep.subr.bf16.mxu1 %v2809_v29 }
 0x33b   : > { %2560 = vmatprep.subr.bf16.mxu0 %v2794_v22 }
 0x33d   : > { %2591 = vmatpush3.bf16.msra.mxu1 %v2809_v29 }
 0x33e   : > { %2561 = vmatpush3.bf16.msra.mxu0 %v2794_v22  ;;  %2592 = vmatprep.subr.bf16.mxu1 %v2810_v30 }
 0x33f   : > { %2562 = vmatprep.subr.bf16.mxu0 %v2795_v23 }
 0x341   : > { %2593 = vmatpush3.bf16.msra.mxu1 %v2810_v30 }
 0x342   : > { %2563 = vmatpush3.bf16.msra.mxu0 %v2795_v23  ;;  %2594 = vmatprep.subr.bf16.mxu1 %v2811_v38 }
 0x343   : > { %2564 = vmatprep.subr.bf16.mxu0 %v2796_v26 }
 0x345   : > { %2595 = vmatpush3.bf16.msra.mxu1 %v2811_v38 }
 0x346   : > { %2565 = vmatpush3.bf16.msra.mxu0 %v2796_v26  ;;  %2596 = vmatprep.subr.bf16.mxu1 %v2812_v39 }
 0x347   : > { %2566 = vmatprep.subr.bf16.mxu0 %v2797_v28 }
 0x349   : > { %2597 = vmatpush3.bf16.msra.mxu1 %v2812_v39 }
 0x34a   : > { %2567 = vmatpush3.bf16.msra.mxu0 %v2797_v28  ;;  %2598 = vmatprep.subr.bf16.mxu1 %v2813_v40 }
 0x34d   : > { %2569 = vmatmul.mubr.bf16.vlgmr.msra.gmra.mxu0 %v2799_v31  ;;  %2599 = vmatpush3.bf16.msra.mxu1 %v2813_v40 }
 0x34e   : > { %2572 = vmatprep.mubr.bf16.mxu0 %v2800_v32 }
 0x355   : > { %2573 = vmatmul.mubr.bf16.gmra.mxu0 %v2801_v33 }
 0x356   : > { %2576 = vmatprep.mubr.bf16.mxu0 %v2802_v34 }
 0x35d   : > { %2577 = vmatmul.mubr.bf16.gmra.mxu0 %v2803_v35 }
 0x35e   : > { %2580 = vmatprep.mubr.bf16.mxu0 %v2804_v36 }
 0x365   : > { %2581 = vmatmul.mubr.bf16.gmra.mxu0 %v2805_v37 }
 0x40d   : > { %v2570_v41 = vpop.f32.mrf.mxu0 }
 0x40e   : > { %v1295_v47 = vadd.f32 %v2570_v41, %v2201_v43 }
 0x40f   : > { %v1286_v42 = vpop.f32.mrf.mxu0 }
 0x410   : > { %v1287_v45 = vadd.f32 %v2201_v43, %v1286_v42  ;;  %v1351_v54 = vmax.f32 %v1295_v47, 0.0 }
 0x411   : > { %v2571_v44 = vpop.f32.mrf.mxu0 }
 0x412   : > { %v1298_v46 = vadd.f32 %v2571_v44, %v2201_v43  ;;  %v1349_v52 = vmax.f32 %v1287_v45, 0.0 }
 0x413   : > { %v1289_v48 = vpop.f32.mrf.mxu0 }
 0x414   : > { %v1290_v49 = vadd.f32 %v2201_v43, %v1289_v48  ;;  %v1352_v50 = vmax.f32 %v1298_v46, 0.0 }
 0x415   : > { %v2574_v51 = vpop.f32.mrf.mxu0 }
 0x416   : > { %v1350_v53 = vmax.f32 %v1290_v49, 0.0  ;;  %v1366_v57 = vpack.c.bf16 %v1352_v50, %v1351_v54  ;;  %v1311_v61 = vadd.f32 %v2574_v51, %v2201_v43 }
 0x417   : > { %v1302_v55 = vpop.f32.mrf.mxu0 }
 0x418   : > { %v1365_v56 = vpack.c.bf16 %v1350_v53, %v1349_v52  ;;  %v1303_v59 = vadd.f32 %v2201_v43, %v1302_v55  ;;  %v1355_v4 = vmax.f32 %v1311_v61, 0.0 }
 0x419   : > { %v2575_v58 = vpop.f32.mrf.mxu0 }
 0x41a   : > { %v1314_v60 = vadd.f32 %v2575_v58, %v2201_v43  ;;  %2600 = vmatprep.mubr.bf16.mxu1 %v1365_v56  ;;  %v1353_v2 = vmax.f32 %v1303_v59, 0.0 }
 0x41b   : > { %v1305_v62 = vpop.f32.mrf.mxu0  ;;  %2601 = vmatmul.mubr.bf16.vlgmr.msra.gmra.mxu1 %v1366_v57 }
 0x41c   : > { %v1306_v63 = vadd.f32 %v2201_v43, %v1305_v62  ;;  %v1356_v0 = vmax.f32 %v1314_v60, 0.0 }
 0x41d   : > { %v2578_v1 = vpop.f32.mrf.mxu0 }
 0x41e   : > { %v1354_v3 = vmax.f32 %v1306_v63, 0.0  ;;  %v1368_v7 = vpack.c.bf16 %v1356_v0, %v1355_v4  ;;  %v1327_v11 = vadd.f32 %v2578_v1, %v2201_v43 }
 0x41f   : > { %v1318_v5 = vpop.f32.mrf.mxu0 }
 0x420   : > { %v1367_v6 = vpack.c.bf16 %v1354_v3, %v1353_v2  ;;  %v1319_v9 = vadd.f32 %v2201_v43, %v1318_v5  ;;  %v1359_v18 = vmax.f32 %v1327_v11, 0.0 }
 0x421   : > { %v2579_v8 = vpop.f32.mrf.mxu0 }
 0x422   : > { %v1330_v10 = vadd.f32 %v2579_v8, %v2201_v43  ;;  %2604 = vmatprep.mubr.bf16.mxu1 %v1367_v6  ;;  %v1357_v16 = vmax.f32 %v1319_v9, 0.0 }
 0x423   : > { %v1321_v12 = vpop.f32.mrf.mxu0  ;;  %2605 = vmatmul.mubr.bf16.gmra.mxu1 %v1368_v7 }
 0x424   : > { %v1322_v13 = vadd.f32 %v2201_v43, %v1321_v12  ;;  %v1360_v14 = vmax.f32 %v1330_v10, 0.0 }
 0x425   : > { %v2582_v15 = vpop.f32.mrf.mxu0 }
 0x426   : > { %v1358_v17 = vmax.f32 %v1322_v13, 0.0  ;;  %v1370_v21 = vpack.c.bf16 %v1360_v14, %v1359_v18  ;;  %v1343_v25 = vadd.f32 %v2582_v15, %v2201_v43 }
 0x427   : > { %v1334_v19 = vpop.f32.mrf.mxu0 }
 0x428   : > { %v1369_v20 = vpack.c.bf16 %v1358_v17, %v1357_v16  ;;  %v1335_v23 = vadd.f32 %v2201_v43, %v1334_v19  ;;  %v1363_v31 = vmax.f32 %v1343_v25, 0.0 }
 0x429   : > { %v2583_v22 = vpop.f32.mrf.mxu0 }
 0x42a   : > { %v1346_v24 = vadd.f32 %v2583_v22, %v2201_v43  ;;  %2608 = vmatprep.mubr.bf16.mxu1 %v1369_v20  ;;  %v1361_v29 = vmax.f32 %v1335_v23, 0.0 }
 0x42b   : > { %v1337_v26 = vpop.f32.mrf.mxu0  ;;  %2609 = vmatmul.mubr.bf16.gmra.mxu1 %v1370_v21 }
 0x42c   : > { %v1338_v27 = vadd.f32 %v2201_v43, %v1337_v26  ;;  %v1364_v28 = vmax.f32 %v1346_v24, 0.0 }
 0x42e   : > { %v1362_v30 = vmax.f32 %v1338_v27, 0.0  ;;  %v1372_v33 = vpack.c.bf16 %v1364_v28, %v1363_v31 }
 0x430   : > { %v1371_v32 = vpack.c.bf16 %v1362_v30, %v1361_v29 }
 0x432   : > { %2612 = vmatprep.mubr.bf16.mxu1 %v1371_v32 }
 0x433   : > { %2613 = vmatmul.mubr.bf16.gmra.mxu1 %v1372_v33 }
 0x4db   : > { %v2602_v34 = vpop.f32.mrf.mxu1 }
 0x4dd   : > { %v1474_v35 = vpop.f32.mrf.mxu1 }
 0x4df   : > { %v2603_v36 = vpop.f32.mrf.mxu1 }
 0x4e0   : > { %v2307_v37 = vpack.c.bf16 %v2603_v36, %v2602_v34 }
 0x4e1   : > { %v1477_v38 = vpop.f32.mrf.mxu1 }
 0x4e2   : > { %2353 = vst [vmem:[#allocation2 + $0x8] sm:$0xff] %v2307_v37   ;;  %v2302_v39 = vpack.c.bf16 %v1477_v38, %v1474_v35 }
 0x4e3   : > { %v2606_v40 = vpop.f32.mrf.mxu1 }
 0x4e4   : > { %2303 = vst [vmem:[#allocation2] sm:$0xff] %v2302_v39  }
 0x4e5   : > { %v1490_v41 = vpop.f32.mrf.mxu1 }
 0x4e7   : > { %v2607_v42 = vpop.f32.mrf.mxu1 }
 0x4e8   : > { %v2317_v43 = vpack.c.bf16 %v2607_v42, %v2606_v40 }
 0x4e9   : > { %v1493_v44 = vpop.f32.mrf.mxu1 }
 0x4ea   : > { %2355 = vst [vmem:[#allocation2 + $0x18] sm:$0xff] %v2317_v43   ;;  %v2312_v45 = vpack.c.bf16 %v1493_v44, %v1490_v41 }
 0x4eb   : > { %v2610_v46 = vpop.f32.mrf.mxu1 }
 0x4ec   : > { %2354 = vst [vmem:[#allocation2 + $0x10] sm:$0xff] %v2312_v45  }
 0x4ed   : > { %v1506_v47 = vpop.f32.mrf.mxu1 }
 0x4ef   : > { %v2611_v48 = vpop.f32.mrf.mxu1 }
 0x4f0   : > { %v2327_v49 = vpack.c.bf16 %v2611_v48, %v2610_v46 }
 0x4f1   : > { %v1509_v50 = vpop.f32.mrf.mxu1 }
 0x4f2   : > { %2357 = vst [vmem:[#allocation2 + $0x28] sm:$0xff] %v2327_v49   ;;  %v2322_v51 = vpack.c.bf16 %v1509_v50, %v1506_v47 }
 0x4f3   : > { %v2614_v52 = vpop.f32.mrf.mxu1 }
 0x4f4   : > { %2356 = vst [vmem:[#allocation2 + $0x20] sm:$0xff] %v2322_v51  }
 0x4f5   : > { %v1522_v53 = vpop.f32.mrf.mxu1 }
 0x4f7   : > { %v2615_v54 = vpop.f32.mrf.mxu1 }
 0x4f8   : > { %v2337_v55 = vpack.c.bf16 %v2615_v54, %v2614_v52 }
 0x4f9   : > { %v1525_v56 = vpop.f32.mrf.mxu1 }
 0x4fa   : > { %2359 = vst [vmem:[#allocation2 + $0x38] sm:$0xff] %v2337_v55   ;;  %v2332_v57 = vpack.c.bf16 %v1525_v56, %v1522_v53 }
 0x4fc   : > { %2358 = vst [vmem:[#allocation2 + $0x30] sm:$0xff] %v2332_v57  }
 0x4fd PF: > { %p2138_p13 = scmp.ge.s32.totalorder %s2960_s15, 10 }
 0x4ff   : > { %1624 = sbr.rel (%p2138_p13) target bundleno = 1293 (0x50d), region = 68 }
 0x504   : > { %v2978_v58 = vmov 0.0  }
 0x505   : > { %1625 = vst [vmem:[%s3261_s4] sm:$0xff] %v2978_v58  ;;  %1626 = vst [vmem:[%s3261_s4 + $0x8] sm:$0xff] %v2978_v58 }
 0x506   : > { %1627 = vst [vmem:[%s3261_s4 + $0x10] sm:$0xff] %v2978_v58  ;;  %1628 = vst [vmem:[%s3261_s4 + $0x18] sm:$0xff] %v2978_v58 }
 0x507   : > { %1629 = vst [vmem:[%s3261_s4 + $0x20] sm:$0xff] %v2978_v58  ;;  %1630 = vst [vmem:[%s3261_s4 + $0x28] sm:$0xff] %v2978_v58 }
 0x508   : > { %1631 = vst [vmem:[%s3261_s4 + $0x30] sm:$0xff] %v2978_v58  ;;  %1632 = vst [vmem:[%s3261_s4 + $0x38] sm:$0xff] %v2978_v58 }
 0x509   : > { %1633 = vst [vmem:[%s3261_s4 + $0x40] sm:$0xff] %v2978_v58  ;;  %1634 = vst [vmem:[%s3261_s4 + $0x48] sm:$0xff] %v2978_v58 }
 0x50a   : > { %1635 = vst [vmem:[%s3261_s4 + $0x50] sm:$0xff] %v2978_v58  ;;  %1636 = vst [vmem:[%s3261_s4 + $0x58] sm:$0xff] %v2978_v58 }
 0x50b   : > { %1637 = vst [vmem:[%s3261_s4 + $0x60] sm:$0xff] %v2978_v58  ;;  %1638 = vst [vmem:[%s3261_s4 + $0x68] sm:$0xff] %v2978_v58 }
 0x50c   : > { %1639 = vst [vmem:[%s3261_s4 + $0x70] sm:$0xff] %v2978_v58  ;;  %1640 = vst [vmem:[%s3261_s4 + $0x78] sm:$0xff] %v2978_v58 }
 0x50d PF: > { %p2139_p0 = scmp.ne.s32.totalorder %s2960_s15, 10 }
 0x50f   : > { %1644 = sbr.rel (%p2139_p0) target bundleno = 1543 (0x607), region = 72 }
 0x514   : > { %v2814_v59 = vld [vmem:[#allocation3 + $0x38] sm:$0xff]   ;;  %v2815_v60 = vld [vmem:[#allocation3 + $0x30] sm:$0xff]   ;;  %v2816_v61 = vld [vmem:[#allocation3 + $0x28] sm:$0xff]  }
 0x515   : > { %2616 = vmatprep.subr.bf16.mxu0 %v2814_v59  ;;  %2664 = vmatprep.subr.bf16.mxu1 %v2814_v59  ;;  %v2817_v62 = vld [vmem:[#allocation3 + $0x20] sm:$0xff]   ;;  %v2818_v1 = vld [vmem:[#allocation3 + $0x18] sm:$0xff]   ;;  %v2819_v2 = vld [vmem:[#allocation3 + $0x10] sm:$0xff]  }
 0x516   : > { %2617 = vmatpush3.bf16.msra.mxu0 %v2814_v59  ;;  %2672 = vmatpush3.bf16.msra.mxu1 %v2814_v59  ;;  %v2822_v63 = vld [vmem:[#allocation4] sm:$0xff]   ;;  %v2820_v3 = vld [vmem:[#allocation3 + $0x8] sm:$0xff]   ;;  %v2826_v7 = vld [vmem:[#allocation4 + $0x10] sm:$0xff]  }
 0x517   : > { %2618 = vmatprep.subr.bf16.mxu0 %v2815_v60  ;;  %2665 = vmatprep.subr.bf16.mxu1 %v2815_v60  ;;  %v2823_v0 = vld [vmem:[#allocation4 + $0x20] sm:$0xff]   ;;  %v2824_v5 = vld [vmem:[#allocation4 + $0x8] sm:$0xff]   ;;  %v2827_v8 = vld [vmem:[#allocation4 + $0x30] sm:$0xff]  }
 0x518   : > { %2632 = vmatprep.mubr.bf16.mxu0 %v2822_v63  ;;  %2640 = vmatprep.mubr.bf16.mxu1 %v2823_v0  ;;  %v2821_v4 = vld [vmem:[#allocation3] sm:$0xff]   ;;  %v2825_v6 = vld [vmem:[#allocation4 + $0x28] sm:$0xff]   ;;  %v2828_v9 = vld [vmem:[#allocation4 + $0x18] sm:$0xff]  }
 0x519   : > { %v2829_v10 = vld [vmem:[#allocation4 + $0x38] sm:$0xff]   ;;  %v2140_v11 = vld [vmem:[#allocation9 + $0x9] ss:$0 sm:$0xff] }
 0x51a   : > { %2619 = vmatpush3.bf16.msra.mxu0 %v2815_v60  ;;  %2673 = vmatpush3.bf16.msra.mxu1 %v2815_v60 }
 0x51b   : > { %2620 = vmatprep.subr.bf16.mxu0 %v2816_v61  ;;  %2666 = vmatprep.subr.bf16.mxu1 %v2816_v61 }
 0x51e   : > { %2621 = vmatpush3.bf16.msra.mxu0 %v2816_v61  ;;  %2674 = vmatpush3.bf16.msra.mxu1 %v2816_v61 }
 0x51f   : > { %2622 = vmatprep.subr.bf16.mxu0 %v2817_v62  ;;  %2667 = vmatprep.subr.bf16.mxu1 %v2817_v62 }
 0x522   : > { %2623 = vmatpush3.bf16.msra.mxu0 %v2817_v62  ;;  %2675 = vmatpush3.bf16.msra.mxu1 %v2817_v62 }
 0x523   : > { %2624 = vmatprep.subr.bf16.mxu0 %v2818_v1  ;;  %2668 = vmatprep.subr.bf16.mxu1 %v2818_v1 }
 0x526   : > { %2625 = vmatpush3.bf16.msra.mxu0 %v2818_v1  ;;  %2676 = vmatpush3.bf16.msra.mxu1 %v2818_v1 }
 0x527   : > { %2626 = vmatprep.subr.bf16.mxu0 %v2819_v2  ;;  %2669 = vmatprep.subr.bf16.mxu1 %v2819_v2 }
 0x52a   : > { %2627 = vmatpush3.bf16.msra.mxu0 %v2819_v2  ;;  %2677 = vmatpush3.bf16.msra.mxu1 %v2819_v2 }
 0x52b   : > { %2628 = vmatprep.subr.bf16.mxu0 %v2820_v3  ;;  %2670 = vmatprep.subr.bf16.mxu1 %v2820_v3 }
 0x52e   : > { %2629 = vmatpush3.bf16.msra.mxu0 %v2820_v3  ;;  %2678 = vmatpush3.bf16.msra.mxu1 %v2820_v3 }
 0x52f   : > { %2630 = vmatprep.subr.bf16.mxu0 %v2821_v4  ;;  %2671 = vmatprep.subr.bf16.mxu1 %v2821_v4 }
 0x532   : > { %2631 = vmatpush3.bf16.msra.mxu0 %v2821_v4  ;;  %2679 = vmatpush3.bf16.msra.mxu1 %v2821_v4 }
 0x535   : > { %2633 = vmatmul.mubr.bf16.vlgmr.msra.gmra.mxu0 %v2824_v5  ;;  %2641 = vmatmul.mubr.bf16.vlgmr.msra.gmra.mxu1 %v2825_v6 }
 0x536   : > { %2636 = vmatprep.mubr.bf16.mxu0 %v2826_v7  ;;  %2644 = vmatprep.mubr.bf16.mxu1 %v2827_v8 }
 0x53d   : > { %2637 = vmatmul.mubr.bf16.gmra.mxu0 %v2828_v9  ;;  %2645 = vmatmul.mubr.bf16.gmra.mxu1 %v2829_v10 }
 0x5f5   : > { %v2634_v12 = vpop.f32.mrf.mxu0  ;;  %v2642_v13 = vpop.f32.mrf.mxu1 }
 0x5f6   : > { %v1824_v14 = vadd.f32 %v2634_v12, %v2140_v11  ;;  %v1856_v15 = vadd.f32 %v2642_v13, %v2140_v11 }
 0x5f7   : > { %v1815_v16 = vpop.f32.mrf.mxu0  ;;  %v1847_v17 = vpop.f32.mrf.mxu1 }
 0x5f8   : > { %1880 = vst [vmem:[%s3261_s4 + $0x10] sm:$0xff] %v1824_v14  ;;  %1888 = vst [vmem:[%s3261_s4 + $0x50] sm:$0xff] %v1856_v15  ;;  %v1816_v18 = vadd.f32 %v2140_v11, %v1815_v16  ;;  %v1848_v19 = vadd.f32 %v2140_v11, %v1847_v17 }
 0x5f9   : > { %v2635_v20 = vpop.f32.mrf.mxu0  ;;  %v2643_v21 = vpop.f32.mrf.mxu1 }
 0x5fa   : > { %1878 = vst [vmem:[%s3261_s4] sm:$0xff] %v1816_v18  ;;  %1886 = vst [vmem:[%s3261_s4 + $0x40] sm:$0xff] %v1848_v19  ;;  %v1827_v22 = vadd.f32 %v2635_v20, %v2140_v11  ;;  %v1859_v23 = vadd.f32 %v2643_v21, %v2140_v11 }
 0x5fb   : > { %v1818_v24 = vpop.f32.mrf.mxu0  ;;  %v1850_v25 = vpop.f32.mrf.mxu1 }
 0x5fc   : > { %1881 = vst [vmem:[%s3261_s4 + $0x18] sm:$0xff] %v1827_v22  ;;  %1889 = vst [vmem:[%s3261_s4 + $0x58] sm:$0xff] %v1859_v23  ;;  %v1819_v26 = vadd.f32 %v2140_v11, %v1818_v24  ;;  %v1851_v27 = vadd.f32 %v2140_v11, %v1850_v25 }
 0x5fd   : > { %v2638_v28 = vpop.f32.mrf.mxu0  ;;  %v2646_v29 = vpop.f32.mrf.mxu1 }
 0x5fe   : > { %1879 = vst [vmem:[%s3261_s4 + $0x8] sm:$0xff] %v1819_v26  ;;  %1887 = vst [vmem:[%s3261_s4 + $0x48] sm:$0xff] %v1851_v27  ;;  %v1840_v30 = vadd.f32 %v2638_v28, %v2140_v11  ;;  %v1872_v31 = vadd.f32 %v2646_v29, %v2140_v11 }
 0x5ff   : > { %v1831_v32 = vpop.f32.mrf.mxu0  ;;  %v1863_v33 = vpop.f32.mrf.mxu1 }
 0x600   : > { %1884 = vst [vmem:[%s3261_s4 + $0x30] sm:$0xff] %v1840_v30  ;;  %1892 = vst [vmem:[%s3261_s4 + $0x70] sm:$0xff] %v1872_v31  ;;  %v1832_v34 = vadd.f32 %v2140_v11, %v1831_v32  ;;  %v1864_v35 = vadd.f32 %v2140_v11, %v1863_v33 }
 0x601   : > { %v2639_v36 = vpop.f32.mrf.mxu0  ;;  %v2647_v37 = vpop.f32.mrf.mxu1 }
 0x602   : > { %1882 = vst [vmem:[%s3261_s4 + $0x20] sm:$0xff] %v1832_v34  ;;  %1890 = vst [vmem:[%s3261_s4 + $0x60] sm:$0xff] %v1864_v35  ;;  %v1843_v38 = vadd.f32 %v2639_v36, %v2140_v11  ;;  %v1875_v39 = vadd.f32 %v2647_v37, %v2140_v11 }
 0x603   : > { %v1834_v40 = vpop.f32.mrf.mxu0  ;;  %v1866_v41 = vpop.f32.mrf.mxu1 }
 0x604   : > { %1885 = vst [vmem:[%s3261_s4 + $0x38] sm:$0xff] %v1843_v38  ;;  %1893 = vst [vmem:[%s3261_s4 + $0x78] sm:$0xff] %v1875_v39  ;;  %v1835_v42 = vadd.f32 %v2140_v11, %v1834_v40  ;;  %v1867_v43 = vadd.f32 %v2140_v11, %v1866_v41 }
 0x606   : > { %1883 = vst [vmem:[%s3261_s4 + $0x28] sm:$0xff] %v1835_v42  ;;  %1891 = vst [vmem:[%s3261_s4 + $0x68] sm:$0xff] %v1867_v43 }
 0x607 PF: > { %s17_s17 = sadd.s32 1, %s2968_s17   ;;  %s3267_s15 = smov %s2964_s16 }
 0x608   : > { %p14_p1 = scmp.ge.s32.totalorder %s17_s17, 13   ;;  %s3268_s16 = smov %s3270_s24 }
 0x60a   :  { %16 = sbr.rel (!%p14_p1) target bundleno = 4 (0x4), region = 110 }
 0x60f   :  { %1916 = vsyncpa [#allocation5], 1 }
 0x610   :  { %1918 = vsyncpa [#allocation5 + $0x1], 1 }
 0x611   :  { %1919 = vsyncpa [#allocation7], 1 }
 0x612   :  { %1920 = vsyncpa [#allocation10], 1 }

</bundles_post_ra>
